<compile_context>
chip_gen: v6e
topology: v6e:2x2x1
jax: 0.10.0
libtpu: 0.0.40
codegen_flags: <defaults>
</compile_context>

<pallas_src>
import math

import jax
import jax.numpy as jnp
from jax.experimental import pallas as pl
from jax.experimental.pallas import tpu as pltpu


_SMALL_FALLBACK_BYTES = 128 * 1024      # below this, pallas_call overhead dominates
_MIN_DMA_SEGMENT_BYTES = 512            # below this per-row segment, strided DMA is inefficient


def _vmem_capacity_bytes():
    """Per-TensorCore VMEM capacity; conservative fallback if query fails."""
    try:
        return int(pltpu.get_tpu_info().vmem_capacity_bytes)
    except Exception:
        return 64 * 1024 * 1024         # v7x per-TC VMEM (smallest of the listed gens)


# ---------------------------------------------------------------------------
# Path A: same-dtype concat as direct HBM->HBM async copies (no VMEM round trip)
# ---------------------------------------------------------------------------
def _make_dma_concat_kernel(widths):
    offsets = []
    off = 0
    for w in widths:
        offsets.append(off)
        off += w

    def kernel(*refs):
        *in_refs, out_ref, sems = refs
        copies = []
        # Issue all DMAs first so they overlap, then wait on all of them.
        for idx, (r, w, o) in enumerate(zip(in_refs, widths, offsets)):
            cp = pltpu.make_async_copy(r, out_ref.at[:, o:o + w], sems.at[idx])
            cp.start()
            copies.append(cp)
        for cp in copies:
            cp.wait()

    return kernel


def _concat_dma(flats, widths, outer, total_width, out_dtype):
    n = len(flats)
    out_bytes = outer * total_width * jnp.dtype(out_dtype).itemsize
    in_bytes = sum(int(f.size) * f.dtype.itemsize for f in flats)
    return pl.pallas_call(
        _make_dma_concat_kernel(widths),
        out_shape=jax.ShapeDtypeStruct((outer, total_width), out_dtype),
        in_specs=[pl.BlockSpec(memory_space=pl.ANY)] * n,
        out_specs=pl.BlockSpec(memory_space=pl.ANY),
        scratch_shapes=[pltpu.SemaphoreType.DMA((n,))],
        compiler_params=pltpu.CompilerParams(has_side_effects=True),
        cost_estimate=pl.CostEstimate(flops=0, transcendentals=0,
                                      bytes_accessed=in_bytes + out_bytes),
    )(*flats)


# ---------------------------------------------------------------------------
# Path B: row-tiled VMEM copy kernel (dtype conversion / tiny segments)
# ---------------------------------------------------------------------------
def _concat_vmem_kernel(*refs):
    """refs = (*in_refs, out_ref); all are 2-D (rows, width_k) VMEM tiles."""
    *in_refs, out_ref = refs
    off = 0
    for r in in_refs:
        w = r.shape[1]
        out_ref[:, off:off + w] = r[...].astype(out_ref.dtype)
        off += w


def _vmem_budget_and_align(flats, out_itemsize):
    vmem_cap = _vmem_capacity_bytes()
    # ~16 MiB/stage on 128 MiB parts (v5e/v6e), ~8 MiB/stage on 64 MiB (v7x).
    budget = min(16 * 1024 * 1024, max(vmem_cap // 8, 2 * 1024 * 1024))
    # Dtype-aware sublane alignment: 8 rows for 4-byte, 16 for 2-byte, 32 for 1-byte.
    min_itemsize = min([f.dtype.itemsize for f in flats] + [out_itemsize])
    align = max(8, 32 // max(int(min_itemsize), 1))
    return vmem_cap, budget, align


def _concat_vmem(flats, widths, outer, total_width, out_dtype):
    out_itemsize = jnp.dtype(out_dtype).itemsize
    bytes_per_row = (sum(w * f.dtype.itemsize for f, w in zip(flats, widths))
                     + total_width * out_itemsize)

    vmem_cap, budget, align = _vmem_budget_and_align(flats, out_itemsize)

    tile_r = max(1, budget // max(int(bytes_per_row), 1))
    if tile_r >= outer:
        tile_r = outer                              # single block == full extent
    else:
        tile_r = max(align, (tile_r // align) * align)
    grid = (pl.cdiv(outer, tile_r),)

    # Explicit scoped-VMEM limit: double-buffered stage plus headroom, capped
    # well under physical VMEM (leaves room for compiler scratch on v7x).
    stage_bytes = tile_r * bytes_per_row
    vmem_limit = min((vmem_cap * 3) // 4, 2 * stage_bytes + 8 * 1024 * 1024)
    vmem_limit = int(max(vmem_limit, 16 * 1024 * 1024))

    out_bytes = outer * total_width * out_itemsize
    in_bytes = sum(int(f.size) * f.dtype.itemsize for f in flats)

    in_specs = [pl.BlockSpec((tile_r, w), lambda i: (i, 0)) for w in widths]
    out_spec = pl.BlockSpec((tile_r, total_width), lambda i: (i, 0))

    return pl.pallas_call(
        _concat_vmem_kernel,
        out_shape=jax.ShapeDtypeStruct((outer, total_width), out_dtype),
        grid=grid,
        in_specs=in_specs,
        out_specs=out_spec,
        compiler_params=pltpu.CompilerParams(
            dimension_semantics=("parallel",),
            vmem_limit_bytes=vmem_limit),
        cost_estimate=pl.CostEstimate(flops=0, transcendentals=0,
                                      bytes_accessed=in_bytes + out_bytes),
    )(*flats)


# ---------------------------------------------------------------------------
# Wrapper
# ---------------------------------------------------------------------------
def concat(inputs, dim):
    """Pallas equivalent of torch.cat(inputs, dim=dim)."""
    assert len(inputs) >= 1
    inputs = [jnp.asarray(x) for x in inputs]
    ndim = inputs[0].ndim
    dim = dim % ndim
    # TODO(synk): jnp.result_type may differ from torch.cat promotion in rare
    # weak-scalar edge cases; identical for the common same/float dtype cases.
    out_dtype = jnp.result_type(*[x.dtype for x in inputs])

    out_shape = list(inputs[0].shape)
    out_shape[dim] = sum(int(x.shape[dim]) for x in inputs)
    out_shape = tuple(out_shape)

    # Drop zero-width pieces (they contribute nothing and would make 0-width blocks).
    parts = [x for x in inputs if x.shape[dim] > 0]
    if not parts:
        return jnp.zeros(out_shape, out_dtype)
    if len(parts) == 1:
        return parts[0].astype(out_dtype)

    shapes = [tuple(x.shape) for x in parts]
    for s in shapes[1:]:
        assert s[:dim] == shapes[0][:dim] and s[dim + 1:] == shapes[0][dim + 1:], shapes

    outer = math.prod(shapes[0][:dim]) if dim > 0 else 1
    inner = math.prod(shapes[0][dim + 1:]) if dim + 1 < ndim else 1
    widths = [s[dim] * inner for s in shapes]
    total_width = sum(widths)
    out_itemsize = jnp.dtype(out_dtype).itemsize

    total_bytes = (sum(int(x.size) * x.dtype.itemsize for x in parts)
                   + outer * total_width * out_itemsize)
    if outer == 0 or inner == 0 or total_bytes < _SMALL_FALLBACK_BYTES:
        # Tiny payload: fixed pallas_call overhead dominates a pure copy.
        return jnp.concatenate([x.astype(out_dtype) for x in parts], axis=dim)

    # Lane-dense 2-D views; contiguous row-major reshape => metadata only.
    flats = [x.reshape(outer, w) for x, w in zip(parts, widths)]

    same_dtype = all(x.dtype == out_dtype for x in parts)
    min_seg_bytes = min(w * x.dtype.itemsize for x, w in zip(parts, widths))
    use_dma = same_dtype and min_seg_bytes >= _MIN_DMA_SEGMENT_BYTES

    if not use_dma:
        # Wide-concat guard: if even the minimal sublane-aligned row tile blows
        # the per-stage VMEM budget, cast up-front and use the DMA path instead
        # of risking VMEM OOM (worst on v7x's 64 MiB VMEM).
        _, budget, align = _vmem_budget_and_align(flats, out_itemsize)
        bytes_per_row = (sum(w * x.dtype.itemsize for x, w in zip(parts, widths))
                         + total_width * out_itemsize)
        if min(align, outer) * bytes_per_row > budget:
            flats = [f.astype(out_dtype) for f in flats]
            use_dma = True

    if use_dma:
        out2d = _concat_dma(flats, widths, outer, total_width, out_dtype)
    else:
        out2d = _concat_vmem(flats, widths, outer, total_width, out_dtype)
    return out2d.reshape(out_shape)


class Concat:
    """Mirror of the PyTorch Concat module: apply children, cat along dim."""

    # TODO(synk): the child modules are arbitrary nn.Modules; they are applied
    # here as plain JAX callables — only the torch.cat is a Pallas kernel.
    def __init__(self, dim, *modules):
        self.dim = dim
        self.modules = list(modules)

    def __call__(self, x):
        outputs = [m(x) for m in self.modules]
        return concat(outputs, self.dim)

    def __len__(self):
        return len(self.modules)


if __name__ == "__main__":
    key = jax.random.PRNGKey(0)

    # ---- Test 1: same-dtype NCHW channel concat (HBM->HBM DMA fast path) ---
    x = jax.random.normal(key, (2, 16, 32, 32), dtype=jnp.float32)
    branch_a = lambda t: t
    branch_b = lambda t: 2.0 * t
    module = Concat(1, branch_a, branch_b)
    out = jax.block_until_ready(module(x))
    ref = jnp.concatenate([branch_a(x), branch_b(x)], axis=1)
    assert out.shape == (2, 32, 32, 32), out.shape
    assert out.dtype == x.dtype, out.dtype
    assert bool(jnp.array_equal(out, ref))
    assert len(module) == 2

    # ---- Test 2: mixed-dtype concat (row-tiled VMEM copy/convert path) -----
    y32 = x
    y16 = (3.0 * x).astype(jnp.bfloat16)
    out2 = jax.block_until_ready(concat([y32, y16], dim=1))
    ref2 = jnp.concatenate([y32, y16.astype(jnp.float32)], axis=1)
    assert out2.shape == (2, 32, 32, 32), out2.shape
    assert out2.dtype == jnp.float32, out2.dtype
    assert bool(jnp.array_equal(out2, ref2))

    # ---- Test 3: tiny last-dim concat (small-payload jnp fallback) ---------
    a = jax.random.normal(key, (2, 4, 16, 16), dtype=jnp.float32)
    b = jax.random.normal(jax.random.PRNGKey(1), (2, 4, 16, 8), dtype=jnp.float32)
    out3 = jax.block_until_ready(concat([a, b], dim=-1))
    ref3 = jnp.concatenate([a, b], axis=-1)
    assert out3.shape == (2, 4, 16, 24), out3.shape
    assert bool(jnp.array_equal(out3, ref3))

    print("KERNEL_OK")
</pallas_src>

<mosaic_0001>
module attributes {stable_mosaic.version = 11 : i64} {
  func.func @kernel(%arg0: memref<2x16384xf32, #tpu.memory_space<any>>, %arg1: memref<2x16384xf32, #tpu.memory_space<any>>, %arg2: memref<2x32768xf32, #tpu.memory_space<any>>, %arg3: memref<2x!tpu.dma_semaphore, #tpu.memory_space<semaphore_mem>>) attributes {dimension_semantics = [], scalar_prefetch = 0 : i64, scratch_operands = 1 : i64, tpu.core_type = #tpu.core_type<tc>} {
    %c0_i32 = arith.constant 0 : i32
    %c0_i32_0 = arith.constant 0 : i32
    %c0_i32_1 = arith.constant 0 : i32
    %0 = tpu.memref_slice %arg2[%c0_i32_0, %c0_i32_1] : memref<2x32768xf32, #tpu.memory_space<any>> -> memref<2x16384xf32, #tpu.memory_space<any>>
    %1 = tpu.memref_slice %arg3[%c0_i32] : memref<2x!tpu.dma_semaphore, #tpu.memory_space<semaphore_mem>> -> memref<1x!tpu.dma_semaphore, #tpu.memory_space<semaphore_mem>>
    %2 = tpu.memref_squeeze %1 : memref<1x!tpu.dma_semaphore, #tpu.memory_space<semaphore_mem>> -> memref<!tpu.dma_semaphore, #tpu.memory_space<semaphore_mem>>
    tpu.enqueue_dma source(%arg0 : memref<2x16384xf32, #tpu.memory_space<any>>) target(%0 : memref<2x16384xf32, #tpu.memory_space<any>>) target_semaphore(%2 : memref<!tpu.dma_semaphore, #tpu.memory_space<semaphore_mem>>)
    %c1_i32 = arith.constant 1 : i32
    %c0_i32_2 = arith.constant 0 : i32
    %c16384_i32 = arith.constant 16384 : i32
    %3 = tpu.memref_slice %arg2[%c0_i32_2, %c16384_i32] : memref<2x32768xf32, #tpu.memory_space<any>> -> memref<2x16384xf32, #tpu.memory_space<any>>
    %4 = tpu.memref_slice %arg3[%c1_i32] : memref<2x!tpu.dma_semaphore, #tpu.memory_space<semaphore_mem>> -> memref<1x!tpu.dma_semaphore, #tpu.memory_space<semaphore_mem>>
    %5 = tpu.memref_squeeze %4 : memref<1x!tpu.dma_semaphore, #tpu.memory_space<semaphore_mem>> -> memref<!tpu.dma_semaphore, #tpu.memory_space<semaphore_mem>>
    tpu.enqueue_dma source(%arg1 : memref<2x16384xf32, #tpu.memory_space<any>>) target(%3 : memref<2x16384xf32, #tpu.memory_space<any>>) target_semaphore(%5 : memref<!tpu.dma_semaphore, #tpu.memory_space<semaphore_mem>>)
    %c0_i32_3 = arith.constant 0 : i32
    %c0_i32_4 = arith.constant 0 : i32
    %c0_i32_5 = arith.constant 0 : i32
    %6 = tpu.memref_slice %arg2[%c0_i32_4, %c0_i32_5] : memref<2x32768xf32, #tpu.memory_space<any>> -> memref<2x16384xf32, #tpu.memory_space<any>>
    %7 = tpu.memref_slice %arg3[%c0_i32_3] : memref<2x!tpu.dma_semaphore, #tpu.memory_space<semaphore_mem>> -> memref<1x!tpu.dma_semaphore, #tpu.memory_space<semaphore_mem>>
    %8 = tpu.memref_squeeze %7 : memref<1x!tpu.dma_semaphore, #tpu.memory_space<semaphore_mem>> -> memref<!tpu.dma_semaphore, #tpu.memory_space<semaphore_mem>>
    tpu.wait_dma2 semaphore(%8 : memref<!tpu.dma_semaphore, #tpu.memory_space<semaphore_mem>>) src(%arg0 : memref<2x16384xf32, #tpu.memory_space<any>>) dst(%6 : memref<2x16384xf32, #tpu.memory_space<any>>)
    %c1_i32_6 = arith.constant 1 : i32
    %c0_i32_7 = arith.constant 0 : i32
    %c16384_i32_8 = arith.constant 16384 : i32
    %9 = tpu.memref_slice %arg2[%c0_i32_7, %c16384_i32_8] : memref<2x32768xf32, #tpu.memory_space<any>> -> memref<2x16384xf32, #tpu.memory_space<any>>
    %10 = tpu.memref_slice %arg3[%c1_i32_6] : memref<2x!tpu.dma_semaphore, #tpu.memory_space<semaphore_mem>> -> memref<1x!tpu.dma_semaphore, #tpu.memory_space<semaphore_mem>>
    %11 = tpu.memref_squeeze %10 : memref<1x!tpu.dma_semaphore, #tpu.memory_space<semaphore_mem>> -> memref<!tpu.dma_semaphore, #tpu.memory_space<semaphore_mem>>
    tpu.wait_dma2 semaphore(%11 : memref<!tpu.dma_semaphore, #tpu.memory_space<semaphore_mem>>) src(%arg1 : memref<2x16384xf32, #tpu.memory_space<any>>) dst(%9 : memref<2x16384xf32, #tpu.memory_space<any>>)
    return
  }
}

</mosaic_0001>

<bundles_post_ra>
// kernel: tpu_custom_call.1
= control target key start
LH: loop header
LB: loop body
LE: loop exit
PB: predicated region body
PF: predicated region fallthrough
CT: control target
= control target key end

     0   :  { %s52_s12 = smov [#allocation2]   ;;  %s53_s13 = smov 131072   ;;  %s83_s0 = inlined_call_operand.hbm [shape: f32[2,16384], index: 0, kind: input, shape index: {}]   ;;  %s84_s2 = inlined_call_operand.hbm [shape: f32[2,32768], index: 2, kind: output, shape index: {}]   ;;  %s85_s1 = inlined_call_operand.hbm [shape: f32[2,16384], index: 1, kind: input, shape index: {}]  }
   0x1   :  { %s14_s11 = scalar_lea.hbm %s84_s2, 4096  ;;  %s54_s14 = smov 0  }
   0x2   :  { %13 = dma.general %s83_s0, 4096, %s84_s2, %s52_s12, %s53_s13, [#allocation4], %s54_s14, 0  }
   0x3   :  { %s55_s19 = smov [#allocation2 + $0x1]  }
   0x4   :  { %22 = dma.general %s85_s1, 4096, %s14_s11, %s55_s19, %s53_s13, [#allocation6], %s54_s14, 0  }
   0x5   :  { %48 = dma.done.wait [#allocation2], 4096 }
   0x6   :  { %49 = vsyncadd [#allocation2], 4294963200 }
   0x7   :  { %50 = dma.done.wait [#allocation2 + $0x1], 4096 }
   0x8   :  { %51 = vsyncadd [#allocation2 + $0x1], 4294963200 }
   0x9   :  { %29 = vsyncmov [#allocation2] }
   0xc   :  { %s30_s22 = vpop.sfrf %29 }
   0xd   :  { %p42_p0 = scmp.ne.s32.totalorder %s30_s22, 0 }
   0xf   :  { %34 = shalt.err (%p42_p0)  }
  0x10   :  { %36 = vsyncmov [#allocation2 + $0x1] }
  0x13   :  { %s37_s23 = vpop.sfrf %36 }
  0x14   :  { %p43_p1 = scmp.ne.s32.totalorder %s37_s23, 0 }
  0x16   :  { %41 = shalt.err (%p43_p1)  }

</bundles_post_ra>
